<compile_context>
chip_gen: v7x
topology: tpu7x:2x2x1
jax: 0.10.0
libtpu: 0.0.40
codegen_flags: <defaults>
</compile_context>

<pallas_src>
import functools

import jax
import jax.numpy as jnp
from jax.experimental import pallas as pl
from jax.experimental.pallas import tpu as pltpu

HIDDEN0 = 100
HIDDEN1 = 50
NUM_CLASSES = 10
P_DROP = 0.5
LANE = 128
SUBLANE = 8
NEG_BIG = -1e30      # "minus infinity" for padded logit lanes (baked into b2)
TILE_CAP = 1024      # max batch rows per grid step (keeps VMEM modest on v5e/v7x)


def _round_up(n, m):
    return ((n + m - 1) // m) * m


def _cdiv(a, b):
    return -(-a // b)


def _pick_tile(batch):
    """Batch tile: >=2 tiles when possible (v7x has 2 TCs), <=TILE_CAP rows,
    minimal round-up waste, multiple of 8 sublanes."""
    b8 = _round_up(batch, SUBLANE)
    if b8 <= 2 * SUBLANE:
        return b8
    n_tiles = max(2, _cdiv(b8, TILE_CAP))
    return _round_up(_cdiv(b8, n_tiles), SUBLANE)


def _keep_mask(shape, row_off, seed_u32, salt):
    """Counter-based keep mask with P(keep)=0.5.  Pure uint32 elementwise ops
    (mul/xor/shift) so it lowers on Mosaic and in interpret mode alike."""
    r = (jax.lax.broadcasted_iota(jnp.int32, shape, 0) + row_off).astype(jnp.uint32)
    c = jax.lax.broadcasted_iota(jnp.int32, shape, 1).astype(jnp.uint32)
    x = r * jnp.uint32(0x01000193) + c + seed_u32 + jnp.uint32(salt)
    x = (x ^ (x >> 16)) * jnp.uint32(0x7FEB352D)
    x = (x ^ (x >> 15)) * jnp.uint32(0x846CA68B)
    x = x ^ (x >> 16)
    return (x >> 31) == jnp.uint32(0)


def _mlp_kernel(seed_ref, x_ref, w0_ref, b0_ref, w1_ref, b1_ref, w2_ref, b2_ref,
                o_ref, *, n_classes, tb, training):
    # fc0: cast the f32 x tile to bf16 in VMEM (no padded bf16 x copy in HBM).
    x = x_ref[...].astype(w0_ref.dtype)
    h0 = jnp.dot(x, w0_ref[...], preferred_element_type=jnp.float32)
    h0 = jnp.maximum(h0 + b0_ref[...], 0.0)

    if training:
        seed_u32 = seed_ref[0].astype(jnp.uint32)
        row_off = pl.program_id(0) * tb
        # 1/(1-p) scaling is folded into w1/w2 at prepare time -> mask only.
        h0 = jnp.where(_keep_mask(h0.shape, row_off, seed_u32, 0x3C6EF372), h0, 0.0)

    # fc1 + relu (+ dropout)
    h1 = jnp.dot(h0.astype(w1_ref.dtype), w1_ref[...],
                 preferred_element_type=jnp.float32)
    h1 = jnp.maximum(h1 + b1_ref[...], 0.0)
    if training:
        h1 = jnp.where(_keep_mask(h1.shape, row_off, seed_u32, 0x9E3779B9), h1, 0.0)

    # fc2 -> logits.  Padded lanes carry NEG_BIG baked into b2 (no in-kernel mask).
    logits = jnp.dot(h1.astype(w2_ref.dtype), w2_ref[...],
                     preferred_element_type=jnp.float32) + b2_ref[...]

    # numerically stable log_softmax over dim=1 (padded lanes contribute exp(...)=0)
    m = jnp.max(logits, axis=1, keepdims=True)
    shifted = logits - m
    lse = jnp.log(jnp.sum(jnp.exp(shifted), axis=1, keepdims=True))
    out = shifted - lse
    o_ref[...] = out[:, :n_classes].astype(o_ref.dtype)


def prepare_params(params, *, training, matmul_dtype=jnp.bfloat16):
    """One-time pad/cast of weights (hoisted out of the per-call path).
    Folds the dropout keep-scale into w1/w2 and the padded-lane logit mask into b2."""
    w0, b0, w1, b1, w2, b2 = params
    image_size = w0.shape[0]
    h0_pad = _round_up(HIDDEN0, LANE)     # 100 -> 128
    h1_pad = _round_up(HIDDEN1, LANE)     # 50  -> 128
    nc_pad = _round_up(NUM_CLASSES, LANE)  # 10  -> 128 (matmul lanes only)
    keep_scale = 1.0 / (1.0 - P_DROP) if training else 1.0

    def pad2(a, rows, cols):
        return jnp.pad(a, ((0, rows - a.shape[0]), (0, cols - a.shape[1])))

    w0p = pad2(w0, image_size, h0_pad).astype(matmul_dtype)
    w1p = (pad2(w1, h0_pad, h1_pad) * keep_scale).astype(matmul_dtype)
    w2p = (pad2(w2, h1_pad, nc_pad) * keep_scale).astype(matmul_dtype)
    b0p = pad2(b0.reshape(1, -1), 1, h0_pad).astype(jnp.float32)
    b1p = pad2(b1.reshape(1, -1), 1, h1_pad).astype(jnp.float32)
    b2p = jnp.full((1, nc_pad), NEG_BIG, jnp.float32)
    b2p = b2p.at[:, :NUM_CLASSES].set(b2.reshape(1, -1).astype(jnp.float32))
    return (w0p, b0p, w1p, b1p, w2p, b2p)


def first_network_with_dropout_forward(x, prepared, *, training=True, seed=0):
    """x: [B, C, H, W] (or [B, image_size]) float32.  Returns log-probs [B, 10]."""
    w0p, b0p, w1p, b1p, w2p, b2p = prepared
    image_size = w0p.shape[0]
    h0_pad, h1_pad, nc_pad = w0p.shape[1], w1p.shape[1], w2p.shape[1]

    x2d = x.reshape(-1, image_size).astype(jnp.float32)   # x.view(-1, image_size)
    batch = x2d.shape[0]
    tb = _pick_tile(batch)
    b_pad = _round_up(batch, tb)
    if b_pad != batch:
        x2d = jnp.pad(x2d, ((0, b_pad - batch), (0, 0)))   # rows only, stays f32
    num_tiles = b_pad // tb

    seed_arr = jnp.asarray([seed], dtype=jnp.int32)
    kernel = functools.partial(_mlp_kernel, n_classes=NUM_CLASSES, tb=tb,
                               training=training)

    grid_spec = pltpu.PrefetchScalarGridSpec(
        num_scalar_prefetch=1,                               # dropout seed (SMEM)
        grid=(num_tiles,),
        in_specs=[
            pl.BlockSpec((tb, image_size), lambda i, s: (i, 0)),      # x tile (f32)
            pl.BlockSpec((image_size, h0_pad), lambda i, s: (0, 0)),  # w0 (resident)
            pl.BlockSpec((1, h0_pad), lambda i, s: (0, 0)),           # b0
            pl.BlockSpec((h0_pad, h1_pad), lambda i, s: (0, 0)),      # w1
            pl.BlockSpec((1, h1_pad), lambda i, s: (0, 0)),           # b1
            pl.BlockSpec((h1_pad, nc_pad), lambda i, s: (0, 0)),      # w2
            pl.BlockSpec((1, nc_pad), lambda i, s: (0, 0)),           # b2
        ],
        out_specs=pl.BlockSpec((tb, NUM_CLASSES), lambda i, s: (i, 0)),
    )

    flops = 2 * b_pad * (image_size * h0_pad + h0_pad * h1_pad + h1_pad * nc_pad)
    bytes_accessed = (b_pad * image_size * 4
                      + (image_size * h0_pad + h0_pad * h1_pad + h1_pad * nc_pad) * 2
                      + (h0_pad + h1_pad + nc_pad) * 4
                      + b_pad * NUM_CLASSES * 4)

    out = pl.pallas_call(
        kernel,
        out_shape=jax.ShapeDtypeStruct((b_pad, NUM_CLASSES), jnp.float32),
        grid_spec=grid_spec,
        compiler_params=pltpu.CompilerParams(
            dimension_semantics=("parallel",),               # shard batch tiles (v7x)
            vmem_limit_bytes=32 * 1024 * 1024),
        cost_estimate=pl.CostEstimate(flops=flops,
                                      transcendentals=b_pad * nc_pad,
                                      bytes_accessed=bytes_accessed),
    )(seed_arr, x2d, w0p, b0p, w1p, b1p, w2p, b2p)

    return out[:batch] if b_pad != batch else out


def init_params(key, image_size):
    """PyTorch Linear stores W as (out, in); we keep the transposed (in, out)
    layout so the kernel computes y = x @ W + b."""
    def linear(k, fan_in, fan_out):
        kw, kb = jax.random.split(k)
        bound = 1.0 / jnp.sqrt(fan_in)
        w = jax.random.uniform(kw, (fan_in, fan_out), jnp.float32, -bound, bound)
        b = jax.random.uniform(kb, (1, fan_out), jnp.float32, -bound, bound)
        return w, b

    k0, k1, k2 = jax.random.split(key, 3)
    w0, b0 = linear(k0, image_size, HIDDEN0)   # fc0: image_size -> 100
    w1, b1 = linear(k1, HIDDEN0, HIDDEN1)      # fc1: 100 -> 50
    w2, b2 = linear(k2, HIDDEN1, NUM_CLASSES)  # fc2: 50 -> 10
    return (w0, b0, w1, b1, w2, b2)


if __name__ == "__main__":
    key = jax.random.PRNGKey(0)
    kx, kp = jax.random.split(key)

    B, C, H, W = 2, 4, 16, 16
    image_size = C * H * W                      # 1024
    x = jax.random.normal(kx, (B, C, H, W), jnp.float32)
    params = init_params(kp, image_size)

    # Training-mode forward (faithful to the module: dropout p=0.5 is active).
    # The in-kernel mask stream necessarily differs from torch's RNG, so check
    # structural properties only.
    prepared_train = prepare_params(params, training=True)
    out_train = first_network_with_dropout_forward(x, prepared_train,
                                                   training=True, seed=42)
    out_train = jax.block_until_ready(out_train)
    assert out_train.shape == (B, NUM_CLASSES)
    assert bool(jnp.all(jnp.isfinite(out_train)))
    assert bool(jnp.allclose(jnp.sum(jnp.exp(out_train), axis=1), 1.0, atol=1e-4))

    # Eval-mode forward (dropout = identity): exact check vs pure-JAX reference
    # using the same bf16-input / f32-accumulate matmul recipe as the kernel.
    prepared_eval = prepare_params(params, training=False)
    out_eval = first_network_with_dropout_forward(x, prepared_eval, training=False)
    out_eval = jax.block_until_ready(out_eval)

    w0, b0, w1, b1, w2, b2 = params
    xr = x.reshape(B, image_size)
    bf16 = jnp.bfloat16
    h = jnp.maximum(jnp.dot(xr.astype(bf16), w0.astype(bf16),
                            preferred_element_type=jnp.float32) + b0, 0.0)
    h = jnp.maximum(jnp.dot(h.astype(bf16), w1.astype(bf16),
                            preferred_element_type=jnp.float32) + b1, 0.0)
    logits = jnp.dot(h.astype(bf16), w2.astype(bf16),
                     preferred_element_type=jnp.float32) + b2
    ref = jax.nn.log_softmax(logits, axis=1)

    assert out_eval.shape == (B, NUM_CLASSES)
    assert bool(jnp.allclose(out_eval, ref, atol=2e-4, rtol=2e-4))

    print("KERNEL_OK")
</pallas_src>

<mosaic_0001>
module attributes {stable_mosaic.version = 11 : i64} {
  func.func @_mlp_kernel(%arg0: i32, %arg1: memref<1xi32, #tpu.memory_space<smem>>, %arg2: memref<8x1024xf32, #tpu.memory_space<vmem>>, %arg3: memref<1024x128xbf16, #tpu.memory_space<vmem>>, %arg4: memref<1x128xf32, #tpu.memory_space<vmem>>, %arg5: memref<128x128xbf16, #tpu.memory_space<vmem>>, %arg6: memref<1x128xf32, #tpu.memory_space<vmem>>, %arg7: memref<128x128xbf16, #tpu.memory_space<vmem>>, %arg8: memref<1x128xf32, #tpu.memory_space<vmem>>, %arg9: memref<8x10xf32, #tpu.memory_space<vmem>>) attributes {dimension_semantics = [#tpu.dimension_semantics<parallel>], iteration_bounds = array<i64: 1>, scalar_prefetch = 1 : i64, scratch_operands = 0 : i64, tpu.core_type = #tpu.core_type<tc>, window_params = [{transform_indices = @transform_0, window_bounds = array<i64: 8, 1024>}, {pipeline_mode = #tpu.pipeline_mode<synchronous>, transform_indices = @transform_1, window_bounds = array<i64: 1024, 128>}, {pipeline_mode = #tpu.pipeline_mode<synchronous>, transform_indices = @transform_2, window_bounds = array<i64: 1, 128>}, {pipeline_mode = #tpu.pipeline_mode<synchronous>, transform_indices = @transform_3, window_bounds = array<i64: 128, 128>}, {pipeline_mode = #tpu.pipeline_mode<synchronous>, transform_indices = @transform_4, window_bounds = array<i64: 1, 128>}, {pipeline_mode = #tpu.pipeline_mode<synchronous>, transform_indices = @transform_5, window_bounds = array<i64: 128, 128>}, {pipeline_mode = #tpu.pipeline_mode<synchronous>, transform_indices = @transform_6, window_bounds = array<i64: 1, 128>}, {transform_indices = @transform_7, window_bounds = array<i64: 8, 10>}]} {
    %c0 = arith.constant 0 : index
    %c0_0 = arith.constant 0 : index
    %0 = vector.load %arg2[%c0, %c0_0] : memref<8x1024xf32, #tpu.memory_space<vmem>>, vector<8x1024xf32>
    %1 = arith.truncf %0 : vector<8x1024xf32> to vector<8x1024xbf16>
    %c0_1 = arith.constant 0 : index
    %c0_2 = arith.constant 0 : index
    %2 = vector.load %arg3[%c0_1, %c0_2] : memref<1024x128xbf16, #tpu.memory_space<vmem>>, vector<1024x128xbf16>
    %cst = arith.constant dense<0.000000e+00> : vector<8x128xf32>
    %3 = tpu.matmul %1, %2, %cst {dimension_numbers = #tpu.dot_dimension_numbers<[1], [0], [0], [1], [0, 0, 1, 1], [], []>} : vector<8x1024xbf16>, vector<1024x128xbf16>, vector<8x128xf32> -> vector<8x128xf32>
    %c0_3 = arith.constant 0 : index
    %c0_4 = arith.constant 0 : index
    %4 = vector.load %arg4[%c0_3, %c0_4] : memref<1x128xf32, #tpu.memory_space<vmem>>, vector<1x128xf32>
    %5 = vector.broadcast %4 : vector<1x128xf32> to vector<8x128xf32>
    %6 = arith.addf %3, %5 : vector<8x128xf32>
    %cst_5 = arith.constant 0.000000e+00 : f32
    %7 = vector.broadcast %cst_5 : f32 to vector<8x128xf32>
    %8 = arith.maximumf %6, %7 : vector<8x128xf32>
    %c0_6 = arith.constant 0 : index
    %9 = memref.load %arg1[%c0_6] : memref<1xi32, #tpu.memory_space<smem>>
    %c8_i32 = arith.constant 8 : i32
    %10 = arith.muli %arg0, %c8_i32 : i32
    %11 = tpu.iota {dimensions = array<i32: 0>} : vector<8x128xi32>
    %12 = vector.broadcast %10 : i32 to vector<8x128xi32>
    %13 = arith.addi %11, %12 : vector<8x128xi32>
    %14 = tpu.iota {dimensions = array<i32: 1>} : vector<8x128xi32>
    %c16777619_i32 = arith.constant 16777619 : i32
    %15 = vector.broadcast %c16777619_i32 : i32 to vector<8x128xi32>
    %16 = arith.muli %13, %15 : vector<8x128xi32>
    %17 = arith.addi %16, %14 : vector<8x128xi32>
    %18 = vector.broadcast %9 : i32 to vector<8x128xi32>
    %19 = arith.addi %17, %18 : vector<8x128xi32>
    %c1013904242_i32 = arith.constant 1013904242 : i32
    %20 = vector.broadcast %c1013904242_i32 : i32 to vector<8x128xi32>
    %21 = arith.addi %19, %20 : vector<8x128xi32>
    %c16_i32 = arith.constant 16 : i32
    %22 = vector.broadcast %c16_i32 : i32 to vector<8x128xi32>
    %23 = arith.shrui %21, %22 : vector<8x128xi32>
    %24 = arith.xori %21, %23 : vector<8x128xi32>
    %c2146121005_i32 = arith.constant 2146121005 : i32
    %25 = vector.broadcast %c2146121005_i32 : i32 to vector<8x128xi32>
    %26 = arith.muli %24, %25 : vector<8x128xi32>
    %c15_i32 = arith.constant 15 : i32
    %27 = vector.broadcast %c15_i32 : i32 to vector<8x128xi32>
    %28 = arith.shrui %26, %27 : vector<8x128xi32>
    %29 = arith.xori %26, %28 : vector<8x128xi32>
    %c-2073254261_i32 = arith.constant -2073254261 : i32
    %30 = vector.broadcast %c-2073254261_i32 : i32 to vector<8x128xi32>
    %31 = arith.muli %29, %30 : vector<8x128xi32>
    %c16_i32_7 = arith.constant 16 : i32
    %32 = vector.broadcast %c16_i32_7 : i32 to vector<8x128xi32>
    %33 = arith.shrui %31, %32 : vector<8x128xi32>
    %34 = arith.xori %31, %33 : vector<8x128xi32>
    %c31_i32 = arith.constant 31 : i32
    %35 = vector.broadcast %c31_i32 : i32 to vector<8x128xi32>
    %36 = arith.shrui %34, %35 : vector<8x128xi32>
    %c0_i32 = arith.constant 0 : i32
    %37 = vector.broadcast %c0_i32 : i32 to vector<8x128xi32>
    %38 = arith.cmpi eq, %36, %37 : vector<8x128xi32>
    %cst_8 = arith.constant 0.000000e+00 : f32
    %39 = vector.broadcast %cst_8 : f32 to vector<8x128xf32>
    %40 = arith.select %38, %8, %39 : vector<8x128xi1>, vector<8x128xf32>
    %41 = arith.truncf %40 : vector<8x128xf32> to vector<8x128xbf16>
    %c0_9 = arith.constant 0 : index
    %c0_10 = arith.constant 0 : index
    %42 = vector.load %arg5[%c0_9, %c0_10] : memref<128x128xbf16, #tpu.memory_space<vmem>>, vector<128x128xbf16>
    %cst_11 = arith.constant dense<0.000000e+00> : vector<8x128xf32>
    %43 = tpu.matmul %41, %42, %cst_11 {dimension_numbers = #tpu.dot_dimension_numbers<[1], [0], [0], [1], [0, 0, 1, 1], [], []>} : vector<8x128xbf16>, vector<128x128xbf16>, vector<8x128xf32> -> vector<8x128xf32>
    %c0_12 = arith.constant 0 : index
    %c0_13 = arith.constant 0 : index
    %44 = vector.load %arg6[%c0_12, %c0_13] : memref<1x128xf32, #tpu.memory_space<vmem>>, vector<1x128xf32>
    %45 = vector.broadcast %44 : vector<1x128xf32> to vector<8x128xf32>
    %46 = arith.addf %43, %45 : vector<8x128xf32>
    %cst_14 = arith.constant 0.000000e+00 : f32
    %47 = vector.broadcast %cst_14 : f32 to vector<8x128xf32>
    %48 = arith.maximumf %46, %47 : vector<8x128xf32>
    %49 = tpu.iota {dimensions = array<i32: 0>} : vector<8x128xi32>
    %50 = vector.broadcast %10 : i32 to vector<8x128xi32>
    %51 = arith.addi %49, %50 : vector<8x128xi32>
    %52 = tpu.iota {dimensions = array<i32: 1>} : vector<8x128xi32>
    %c16777619_i32_15 = arith.constant 16777619 : i32
    %53 = vector.broadcast %c16777619_i32_15 : i32 to vector<8x128xi32>
    %54 = arith.muli %51, %53 : vector<8x128xi32>
    %55 = arith.addi %54, %52 : vector<8x128xi32>
    %56 = vector.broadcast %9 : i32 to vector<8x128xi32>
    %57 = arith.addi %55, %56 : vector<8x128xi32>
    %c-1640531527_i32 = arith.constant -1640531527 : i32
    %58 = vector.broadcast %c-1640531527_i32 : i32 to vector<8x128xi32>
    %59 = arith.addi %57, %58 : vector<8x128xi32>
    %c16_i32_16 = arith.constant 16 : i32
    %60 = vector.broadcast %c16_i32_16 : i32 to vector<8x128xi32>
    %61 = arith.shrui %59, %60 : vector<8x128xi32>
    %62 = arith.xori %59, %61 : vector<8x128xi32>
    %c2146121005_i32_17 = arith.constant 2146121005 : i32
    %63 = vector.broadcast %c2146121005_i32_17 : i32 to vector<8x128xi32>
    %64 = arith.muli %62, %63 : vector<8x128xi32>
    %c15_i32_18 = arith.constant 15 : i32
    %65 = vector.broadcast %c15_i32_18 : i32 to vector<8x128xi32>
    %66 = arith.shrui %64, %65 : vector<8x128xi32>
    %67 = arith.xori %64, %66 : vector<8x128xi32>
    %c-2073254261_i32_19 = arith.constant -2073254261 : i32
    %68 = vector.broadcast %c-2073254261_i32_19 : i32 to vector<8x128xi32>
    %69 = arith.muli %67, %68 : vector<8x128xi32>
    %c16_i32_20 = arith.constant 16 : i32
    %70 = vector.broadcast %c16_i32_20 : i32 to vector<8x128xi32>
    %71 = arith.shrui %69, %70 : vector<8x128xi32>
    %72 = arith.xori %69, %71 : vector<8x128xi32>
    %c31_i32_21 = arith.constant 31 : i32
    %73 = vector.broadcast %c31_i32_21 : i32 to vector<8x128xi32>
    %74 = arith.shrui %72, %73 : vector<8x128xi32>
    %c0_i32_22 = arith.constant 0 : i32
    %75 = vector.broadcast %c0_i32_22 : i32 to vector<8x128xi32>
    %76 = arith.cmpi eq, %74, %75 : vector<8x128xi32>
    %cst_23 = arith.constant 0.000000e+00 : f32
    %77 = vector.broadcast %cst_23 : f32 to vector<8x128xf32>
    %78 = arith.select %76, %48, %77 : vector<8x128xi1>, vector<8x128xf32>
    %79 = arith.truncf %78 : vector<8x128xf32> to vector<8x128xbf16>
    %c0_24 = arith.constant 0 : index
    %c0_25 = arith.constant 0 : index
    %80 = vector.load %arg7[%c0_24, %c0_25] : memref<128x128xbf16, #tpu.memory_space<vmem>>, vector<128x128xbf16>
    %cst_26 = arith.constant dense<0.000000e+00> : vector<8x128xf32>
    %81 = tpu.matmul %79, %80, %cst_26 {dimension_numbers = #tpu.dot_dimension_numbers<[1], [0], [0], [1], [0, 0, 1, 1], [], []>} : vector<8x128xbf16>, vector<128x128xbf16>, vector<8x128xf32> -> vector<8x128xf32>
    %c0_27 = arith.constant 0 : index
    %c0_28 = arith.constant 0 : index
    %82 = vector.load %arg8[%c0_27, %c0_28] : memref<1x128xf32, #tpu.memory_space<vmem>>, vector<1x128xf32>
    %83 = vector.broadcast %82 : vector<1x128xf32> to vector<8x128xf32>
    %84 = arith.addf %81, %83 : vector<8x128xf32>
    %cst_29 = arith.constant dense<0xFF800000> : vector<8xf32>
    %85 = vector.multi_reduction <maximumf>, %84, %cst_29 [1] : vector<8x128xf32> to vector<8xf32>
    %86 = vector.shape_cast %85 : vector<8xf32> to vector<8x1xf32>
    %87 = vector.broadcast %86 : vector<8x1xf32> to vector<8x128xf32>
    %88 = arith.subf %84, %87 : vector<8x128xf32>
    %89 = math.exp %88 : vector<8x128xf32>
    %cst_30 = arith.constant dense<0.000000e+00> : vector<8xf32>
    %90 = vector.multi_reduction <add>, %89, %cst_30 [1] : vector<8x128xf32> to vector<8xf32>
    %91 = vector.shape_cast %90 : vector<8xf32> to vector<8x1xf32>
    %92 = math.log %91 : vector<8x1xf32>
    %93 = vector.broadcast %92 : vector<8x1xf32> to vector<8x128xf32>
    %94 = arith.subf %88, %93 : vector<8x128xf32>
    %95 = vector.extract_strided_slice %94 {offsets = [0, 0], sizes = [8, 10], strides = [1, 1]} : vector<8x128xf32> to vector<8x10xf32>
    %c0_31 = arith.constant 0 : index
    %c0_32 = arith.constant 0 : index
    %96 = vector.load %arg9[%c0_31, %c0_32] : memref<8x10xf32, #tpu.memory_space<vmem>>, vector<8x10xf32>
    tpu.vector_store %arg9[%c0_31, %c0_32], %95 {strides = array<i32>} : memref<8x10xf32, #tpu.memory_space<vmem>>, vector<8x10xf32>,
    return
  }
  func.func @transform_0(%arg0: i32, %arg1: memref<1xi32, #tpu.memory_space<smem>>) -> (i32, i32) {
    %c0_i32 = arith.constant 0 : i32
    %c0_i32_0 = arith.constant 0 : i32
    return %arg0, %c0_i32 : i32, i32
  }
  func.func @transform_1(%arg0: i32, %arg1: memref<1xi32, #tpu.memory_space<smem>>) -> (i32, i32) {
    %c0_i32 = arith.constant 0 : i32
    %c0_i32_0 = arith.constant 0 : i32
    %c0_i32_1 = arith.constant 0 : i32
    return %c0_i32, %c0_i32_0 : i32, i32
  }
  func.func @transform_2(%arg0: i32, %arg1: memref<1xi32, #tpu.memory_space<smem>>) -> (i32, i32) {
    %c0_i32 = arith.constant 0 : i32
    %c0_i32_0 = arith.constant 0 : i32
    %c0_i32_1 = arith.constant 0 : i32
    return %c0_i32, %c0_i32_0 : i32, i32
  }
  func.func @transform_3(%arg0: i32, %arg1: memref<1xi32, #tpu.memory_space<smem>>) -> (i32, i32) {
    %c0_i32 = arith.constant 0 : i32
    %c0_i32_0 = arith.constant 0 : i32
    %c0_i32_1 = arith.constant 0 : i32
    return %c0_i32, %c0_i32_0 : i32, i32
  }
  func.func @transform_4(%arg0: i32, %arg1: memref<1xi32, #tpu.memory_space<smem>>) -> (i32, i32) {
    %c0_i32 = arith.constant 0 : i32
    %c0_i32_0 = arith.constant 0 : i32
    %c0_i32_1 = arith.constant 0 : i32
    return %c0_i32, %c0_i32_0 : i32, i32
  }
  func.func @transform_5(%arg0: i32, %arg1: memref<1xi32, #tpu.memory_space<smem>>) -> (i32, i32) {
    %c0_i32 = arith.constant 0 : i32
    %c0_i32_0 = arith.constant 0 : i32
    %c0_i32_1 = arith.constant 0 : i32
    return %c0_i32, %c0_i32_0 : i32, i32
  }
  func.func @transform_6(%arg0: i32, %arg1: memref<1xi32, #tpu.memory_space<smem>>) -> (i32, i32) {
    %c0_i32 = arith.constant 0 : i32
    %c0_i32_0 = arith.constant 0 : i32
    %c0_i32_1 = arith.constant 0 : i32
    return %c0_i32, %c0_i32_0 : i32, i32
  }
  func.func @transform_7(%arg0: i32, %arg1: memref<1xi32, #tpu.memory_space<smem>>) -> (i32, i32) {
    %c0_i32 = arith.constant 0 : i32
    %c0_i32_0 = arith.constant 0 : i32
    return %arg0, %c0_i32 : i32, i32
  }
}

</mosaic_0001>

<bundles_post_ra>
// kernel: tpu_custom_call.1
= control target key start
LH: loop header
LB: loop body
LE: loop exit
PB: predicated region body
PF: predicated region fallthrough
CT: control target
= control target key end

     0   :  { %14 = vsyncpa [#allocation5], 0  ;;  %s1668_s0 = inlined_call_operand.<no memory space> [shape: s32[1], index: 0, kind: input, shape index: {}]   ;;  %s1669_s1 = inlined_call_operand.hbm [shape: f32[8,1024], index: 1, kind: input, shape index: {}]   ;;  %s1670_s2 = inlined_call_operand.hbm [shape: bf16[1024,128], index: 2, kind: input, shape index: {}]   ;;  %s1671_s3 = inlined_call_operand.vmem [shape: f32[1,128], index: 3, kind: input, shape index: {}]   ;;  %s1672_s4 = inlined_call_operand.hbm [shape: bf16[128,128], index: 4, kind: input, shape index: {}]   ;;  %s1673_s5 = inlined_call_operand.vmem [shape: f32[1,128], index: 5, kind: input, shape index: {}]   ;;  %s1674_s6 = inlined_call_operand.hbm [shape: bf16[128,128], index: 6, kind: input, shape index: {}]   ;;  %s1675_s7 = inlined_call_operand.vmem [shape: f32[1,128], index: 7, kind: input, shape index: {}]   ;;  %s1676_s8 = inlined_call_operand.hbm [shape: f32[8,10], index: 8, kind: output, shape index: {}]  }
   0x1   :  { %15 = vsyncpa [#allocation8], 0 }
   0x2   :  { %16 = vsyncpa [#allocation11], 0 }
   0x3   :  { %17 = vsyncpa [#allocation6], 0  ;;  %s1515_s27 = smov [#allocation7]   ;;  %s1397_s9 = scalar_lea.hbm %s1670_s2, 8192 }
   0x4   :  { %s33_s28 = sshll.u32 %s1515_s27, 4  ;;  %p1398_p0 = scmp.ne.s32.totalorder %s1670_s2, %s1397_s9  ;;  %s34_s28 = int_to_ptr.vmem [resolvable:$true] %s33_s28 }
   0x5   :  { %p1401_p1 = scmp.lt.u32.totalorder %s1397_s9, %s1670_s2 }
   0x7   :  { %p1403_p2 = pnand %p1401_p1, %p1398_p0 }
   0x9   :  { %1406 = shalt.err (!%p1403_p2)
}
   0xa   :  { %s1407_s14 = scalar_lea.vmem %s34_s28, 8192  ;;  %p1412_p4 = scmp.lt.s32.totalorder %s34_s28, %s34_s28 }
   0xb   :  { %p1408_p3 = scmp.ne.s32.totalorder %s34_s28, %s1407_s14  ;;  %p1413_p5 = scmp.lt.s32.totalorder %s1407_s14, %s1407_s14 }
   0xd   :  { %p1414_p6 = por %p1413_p5, %p1412_p4 }
   0xf   :  { %p1415_p7 = pnand %p1414_p6, %p1408_p3 }
  0x11   :  { %1418 = shalt.err (!%p1415_p7)
}
  0x12   :  { %s1516_s15 = smov 64   ;;  %s1517_s16 = smov 4  }
  0x13   :  { %39 = dma.hbm_to_vmem [thread:$0]  %s1670_s2, 8192, %s34_s28, [#allocation8], %s1516_s15, %s1516_s15, %s1517_s16  }
  0x14   :  { %s1518_s19 = smov [#allocation4]   ;;  %s1519_s21 = smov [#allocation9]  }
  0x15   :  { %s24_s20 = sshll.u32 %s1518_s19, 4  ;;  %s47_s22 = sshll.u32 %s1519_s21, 4  ;;  %s25_s20 = int_to_ptr.vmem [resolvable:$true] %s24_s20  ;;  %s48_s22 = int_to_ptr.vmem [resolvable:$true] %s47_s22 }
  0x16   :  { %s1419_s25 = scalar_lea.hbm %s1669_s1, 1024 }
  0x17   :  { %p1420_p8 = scmp.ne.s32.totalorder %s1669_s1, %s1419_s25  ;;  %p1423_p9 = scmp.lt.u32.totalorder %s1419_s25, %s1669_s1 }
  0x19   :  { %p1425_p10 = pnand %p1423_p9, %p1420_p8 }
  0x1b   :  { %1428 = shalt.err (!%p1425_p10)
}
  0x1c   :  { %s1429_s2 = scalar_lea.vmem %s25_s20, 1024  ;;  %p1434_p12 = scmp.lt.s32.totalorder %s25_s20, %s25_s20 }
  0x1d   :  { %p1430_p11 = scmp.ne.s32.totalorder %s25_s20, %s1429_s2  ;;  %p1435_p13 = scmp.lt.s32.totalorder %s1429_s2, %s1429_s2 }
  0x1f   :  { %p1436_p0 = por %p1435_p13, %p1434_p12 }
  0x21   :  { %p1437_p1 = pnand %p1436_p0, %p1430_p11 }
  0x23   :  { %1440 = shalt.err (!%p1437_p1)
}
  0x24   :  { %27 = dma.hbm_to_vmem [thread:$0]  %s1669_s1, 1024, %s25_s20, [#allocation5]  }
  0x25   :  { %s1441_s12 = scalar_lea.hbm %s1672_s4, 1024 }
  0x26   :  { %p1442_p2 = scmp.ne.s32.totalorder %s1672_s4, %s1441_s12  ;;  %p1445_p3 = scmp.lt.u32.totalorder %s1441_s12, %s1672_s4 }
  0x28   :  { %p1447_p4 = pnand %p1445_p3, %p1442_p2 }
  0x2a   :  { %1450 = shalt.err (!%p1447_p4)
}
  0x2b   :  { %s1451_s19 = scalar_lea.vmem %s48_s22, 1024  ;;  %p1456_p6 = scmp.lt.s32.totalorder %s48_s22, %s48_s22 }
  0x2c   :  { %p1452_p5 = scmp.ne.s32.totalorder %s48_s22, %s1451_s19  ;;  %p1457_p7 = scmp.lt.s32.totalorder %s1451_s19, %s1451_s19 }
  0x2e   :  { %p1458_p8 = por %p1457_p7, %p1456_p6 }
  0x30   :  { %p1459_p9 = pnand %p1458_p8, %p1452_p5 }
  0x32   :  { %1462 = shalt.err (!%p1459_p9)
}
  0x33   :  { %53 = dma.hbm_to_vmem [thread:$0]  %s1672_s4, 1024, %s48_s22, [#allocation8], %s1516_s15, %s1516_s15, %s1517_s16  }
  0x34   :  { %s1520_s21 = smov [#allocation10]   ;;  %s1463_s26 = scalar_lea.hbm %s1674_s6, 1024 }
  0x35   :  { %s61_s23 = sshll.u32 %s1520_s21, 4  ;;  %p1464_p10 = scmp.ne.s32.totalorder %s1674_s6, %s1463_s26  ;;  %s62_s23 = int_to_ptr.vmem [resolvable:$true] %s61_s23 }
  0x36   :  { %p1467_p11 = scmp.lt.u32.totalorder %s1463_s26, %s1674_s6 }
  0x38   :  { %p1469_p12 = pnand %p1467_p11, %p1464_p10 }
  0x3a   :  { %1472 = shalt.err (!%p1469_p12)
}
  0x3b   :  { %s1473_s28 = scalar_lea.vmem %s62_s23, 1024  ;;  %p1478_p0 = scmp.lt.s32.totalorder %s62_s23, %s62_s23 }
  0x3c   :  { %p1474_p13 = scmp.ne.s32.totalorder %s62_s23, %s1473_s28  ;;  %p1479_p1 = scmp.lt.s32.totalorder %s1473_s28, %s1473_s28 }
  0x3e   :  { %p1480_p2 = por %p1479_p1, %p1478_p0 }
  0x40   :  { %p1481_p3 = pnand %p1480_p2, %p1474_p13 }
  0x42   :  { %1484 = shalt.err (!%p1481_p3)
}
  0x43   :  { %67 = dma.hbm_to_vmem [thread:$0]  %s1674_s6, 1024, %s62_s23, [#allocation11], %s1516_s15, %s1516_s15, %s1517_s16  }
  0x44   :  { %1507 = dma.done.wait [#allocation5], 1024  }
  0x45   :  { %1508 = vsyncadd [#allocation5], 4294966272 }
  0x46   :  { %1509 = dma.done.wait [#allocation8], 9216  }
  0x47   :  { %1510 = vsyncadd [#allocation8], 4294958080 }
  0x48   :  { %1511 = dma.done.wait [#allocation11], 1024  }
  0x49   :  { %1512 = vsyncadd [#allocation11], 4294966272  ;;  %v1313_v0 = vld [vmem:[#allocation7 + $0x40] sm:$0xff]   ;;  %v1317_v4 = vld [vmem:[#allocation7 + $0x48] sm:$0xff]   ;;  %vm1522_vm0 = vmmov 0   ;;  %vm1050_vm5 = vcmask 80896  }
  0x4a   :  { %v1314_v1 = vld [vmem:[#allocation7 + $0xc0] sm:$0xff]   ;;  %1158 = vmatprep.subr.bf16.mxu0 %v1313_v0  ;;  %v1318_v5 = vld [vmem:[#allocation7 + $0xc8] sm:$0xff]   ;;  %v1321_v8 = vld [vmem:[#allocation7 + $0x50] sm:$0xff]  }
  0x4b   :  { %v1315_v2 = vld [vmem:[#allocation7] sm:$0xff]   ;;  %1180 = vmatprep.subr.bf16.mxu1 %v1314_v1  ;;  %v1319_v6 = vld [vmem:[#allocation7 + $0x8] sm:$0xff]   ;;  %v1322_v9 = vld [vmem:[#allocation7 + $0xd0] sm:$0xff]  }
  0x4c   :  { %v1316_v3 = vld [vmem:[#allocation7 + $0x80] sm:$0xff]   ;;  %1159 = vmatpush3.bf16.msra.mxu0 %v1315_v2  ;;  %v1320_v7 = vld [vmem:[#allocation7 + $0x88] sm:$0xff]   ;;  %v1323_v10 = vld [vmem:[#allocation7 + $0x10] sm:$0xff]  }
  0x4d   :  { %1181 = vmatpush3.bf16.msra.mxu1 %v1316_v3  ;;  %1160 = vmatprep.subr.bf16.mxu0 %v1317_v4  ;;  %v1324_v11 = vld [vmem:[#allocation7 + $0x90] sm:$0xff]   ;;  %v1325_v12 = vld [vmem:[#allocation7 + $0x58] sm:$0xff]   ;;  %v1329_v16 = vld [vmem:[#allocation7 + $0x60] sm:$0xff]  }
  0x4e   :  { %1182 = vmatprep.subr.bf16.mxu1 %v1318_v5  ;;  %v1326_v13 = vld [vmem:[#allocation7 + $0xd8] sm:$0xff]   ;;  %v1330_v17 = vld [vmem:[#allocation7 + $0xe0] sm:$0xff]   ;;  %v1333_v20 = vld [vmem:[#allocation7 + $0x68] sm:$0xff]  }
  0x4f   :  { %v1327_v14 = vld [vmem:[#allocation7 + $0x18] sm:$0xff]   ;;  %v1331_v18 = vld [vmem:[#allocation7 + $0x20] sm:$0xff]   ;;  %v1334_v21 = vld [vmem:[#allocation7 + $0xe8] sm:$0xff]  }
  0x50   :  { %1161 = vmatpush3.bf16.msra.mxu0 %v1319_v6  ;;  %v1328_v15 = vld [vmem:[#allocation7 + $0x98] sm:$0xff]   ;;  %v1332_v19 = vld [vmem:[#allocation7 + $0xa0] sm:$0xff]   ;;  %v1335_v22 = vld [vmem:[#allocation7 + $0x28] sm:$0xff]  }
  0x51   :  { %1183 = vmatpush3.bf16.msra.mxu1 %v1320_v7  ;;  %1162 = vmatprep.subr.bf16.mxu0 %v1321_v8  ;;  %v1336_v23 = vld [vmem:[#allocation7 + $0xa8] sm:$0xff]   ;;  %v1337_v24 = vld [vmem:[#allocation7 + $0x70] sm:$0xff]   ;;  %v1341_v28 = vld [vmem:[#allocation7 + $0x78] sm:$0xff]  }
  0x52   :  { %1184 = vmatprep.subr.bf16.mxu1 %v1322_v9  ;;  %v1338_v25 = vld [vmem:[#allocation7 + $0xf0] sm:$0xff]   ;;  %v1342_v29 = vld [vmem:[#allocation7 + $0xf8] sm:$0xff]   ;;  %v84_v32 = vld [vmem:[#allocation4 + $0x8] sm:$0xff] }
  0x53   :  { %v1339_v26 = vld [vmem:[#allocation7 + $0x30] sm:$0xff]   ;;  %v1343_v30 = vld [vmem:[#allocation7 + $0x38] sm:$0xff]   ;;  %v83_v34 = vld [vmem:[#allocation4] sm:$0xff]  ;;  %v92_v35 = vpack.c.bf16 %v84_v32, %v84_v32 }
  0x54   :  { %1163 = vmatpush3.bf16.msra.mxu0 %v1323_v10  ;;  %v1340_v27 = vld [vmem:[#allocation7 + $0xb0] sm:$0xff]   ;;  %v1344_v31 = vld [vmem:[#allocation7 + $0xb8] sm:$0xff]   ;;  %v91_v37 = vpack.c.bf16 %v83_v34, %v83_v34  ;;  %v1345_v40 = vld [vmem:[#allocation7 + $0x140] sm:$0xff]  }
  0x55   :  { %1185 = vmatpush3.bf16.msra.mxu1 %v1324_v11  ;;  %1164 = vmatprep.subr.bf16.mxu0 %v1325_v12  ;;  %v86_v33 = vld [vmem:[#allocation4 + $0x18] sm:$0xff]  ;;  %v85_v38 = vld [vmem:[#allocation4 + $0x10] sm:$0xff]  ;;  %v1346_v41 = vld [vmem:[#allocation7 + $0x1c0] sm:$0xff]  }
  0x56   :  { %1186 = vmatprep.subr.bf16.mxu1 %v1326_v13  ;;  %v94_v36 = vpack.c.bf16 %v86_v33, %v86_v33  ;;  %v93_v39 = vpack.c.bf16 %v85_v38, %v85_v38  ;;  %650 = vmatprep.mubr.bf16.mxu0 %v92_v35  ;;  %v1347_v42 = vld [vmem:[#allocation7 + $0x100] sm:$0xff]   ;;  %v1349_v44 = vld [vmem:[#allocation7 + $0x148] sm:$0xff]   ;;  %v1353_v48 = vld [vmem:[#allocation7 + $0x150] sm:$0xff]  }
  0x57   :  { %v1348_v43 = vld [vmem:[#allocation7 + $0x180] sm:$0xff]   ;;  %v1350_v45 = vld [vmem:[#allocation7 + $0x1c8] sm:$0xff]   ;;  %v1354_v49 = vld [vmem:[#allocation7 + $0x1d0] sm:$0xff]  }
  0x58   :  { %1165 = vmatpush3.bf16.msra.mxu0 %v1327_v14  ;;  %690 = vmatprep.mubr.bf16.mxu1 %v94_v36  ;;  %v1351_v46 = vld [vmem:[#allocation7 + $0x108] sm:$0xff]   ;;  %v1355_v50 = vld [vmem:[#allocation7 + $0x110] sm:$0xff]   ;;  %v1357_v52 = vld [vmem:[#allocation7 + $0x158] sm:$0xff]   ;;  %v789_v36 = vstv %s1668_s0 }
  0x59   :  { %1187 = vmatpush3.bf16.msra.mxu1 %v1328_v15  ;;  %1166 = vmatprep.subr.bf16.mxu0 %v1329_v16  ;;  %v1352_v47 = vld [vmem:[#allocation7 + $0x188] sm:$0xff]   ;;  %v1356_v51 = vld [vmem:[#allocation7 + $0x190] sm:$0xff]   ;;  %v1358_v53 = vld [vmem:[#allocation7 + $0x1d8] sm:$0xff]  }
  0x5a   :  { %1188 = vmatprep.subr.bf16.mxu1 %v1330_v17  ;;  %v1359_v54 = vld [vmem:[#allocation7 + $0x118] sm:$0xff]   ;;  %v1361_v56 = vld [vmem:[#allocation7 + $0x160] sm:$0xff]   ;;  %v1365_v60 = vld [vmem:[#allocation7 + $0x168] sm:$0xff]   ;;  %v1521_v17 = vmov 0.0  }
  0x5b   :  { %v1360_v55 = vld [vmem:[#allocation7 + $0x198] sm:$0xff]   ;;  %v1362_v57 = vld [vmem:[#allocation7 + $0x1e0] sm:$0xff]   ;;  %v1366_v61 = vld [vmem:[#allocation7 + $0x1e8] sm:$0xff]  }
  0x5c   :  { %1167 = vmatpush3.bf16.msra.mxu0 %v1331_v18  ;;  %v1363_v58 = vld [vmem:[#allocation7 + $0x120] sm:$0xff]   ;;  %v1367_v62 = vld [vmem:[#allocation7 + $0x128] sm:$0xff]   ;;  %v1369_v0 = vld [vmem:[#allocation7 + $0x170] sm:$0xff]  }
  0x5d   :  { %1189 = vmatpush3.bf16.msra.mxu1 %v1332_v19  ;;  %1168 = vmatprep.subr.bf16.mxu0 %v1333_v20  ;;  %v1364_v59 = vld [vmem:[#allocation7 + $0x1a0] sm:$0xff]   ;;  %v1368_v63 = vld [vmem:[#allocation7 + $0x1a8] sm:$0xff]   ;;  %v1370_v1 = vld [vmem:[#allocation7 + $0x1f0] sm:$0xff]  }
  0x5e   :  { %1190 = vmatprep.subr.bf16.mxu1 %v1334_v21  ;;  %v1371_v2 = vld [vmem:[#allocation7 + $0x130] sm:$0xff]   ;;  %v1373_v4 = vld [vmem:[#allocation7 + $0x178] sm:$0xff]   ;;  %v88_v8 = vld [vmem:[#allocation4 + $0x28] sm:$0xff] }
  0x5f   :  { %v1372_v3 = vld [vmem:[#allocation7 + $0x1b0] sm:$0xff]   ;;  %v1374_v5 = vld [vmem:[#allocation7 + $0x1f8] sm:$0xff]   ;;  %v96_v10 = vpack.c.bf16 %v88_v8, %v88_v8  ;;  %v87_v12 = vld [vmem:[#allocation4 + $0x20] sm:$0xff] }
  0x60   :  { %1169 = vmatpush3.bf16.msra.mxu0 %v1335_v22  ;;  %v1375_v6 = vld [vmem:[#allocation7 + $0x138] sm:$0xff]   ;;  %v89_v13 = vld [vmem:[#allocation4 + $0x30] sm:$0xff]  ;;  %v95_v14 = vpack.c.bf16 %v87_v12, %v87_v12  ;;  %v1377_v16 = vld [vmem:[#allocation9] sm:$0xff]  }
  0x61   :  { %1191 = vmatpush3.bf16.msra.mxu1 %v1336_v23  ;;  %1170 = vmatprep.subr.bf16.mxu0 %v1337_v24  ;;  %v1376_v7 = vld [vmem:[#allocation7 + $0x1b8] sm:$0xff]   ;;  %v97_v15 = vpack.c.bf16 %v89_v13, %v89_v13  ;;  %v1378_v18 = vld [vmem:[#allocation9 + $0x8] sm:$0xff]   ;;  %v1379_v19 = vld [vmem:[#allocation9 + $0x10] sm:$0xff]  }
  0x62   :  { %1192 = vmatprep.subr.bf16.mxu1 %v1338_v25  ;;  %v90_v9 = vld [vmem:[#allocation4 + $0x38] sm:$0xff]  ;;  %v1381_v21 = vld [vmem:[#allocation9 + $0x20] sm:$0xff]   ;;  %v1382_v22 = vld [vmem:[#allocation9 + $0x28] sm:$0xff]  }
  0x63   :  { %v98_v11 = vpack.c.bf16 %v90_v9, %v90_v9  ;;  %v1380_v20 = vld [vmem:[#allocation9 + $0x18] sm:$0xff]   ;;  %v1383_v23 = vld [vmem:[#allocation9 + $0x30] sm:$0xff]   ;;  %v1385_v25 = vld [vmem:[#allocation10] sm:$0xff]  }
  0x64   :  { %1171 = vmatpush3.bf16.msra.mxu0 %v1339_v26  ;;  %v1384_v24 = vld [vmem:[#allocation9 + $0x38] sm:$0xff]   ;;  %v1386_v26 = vld [vmem:[#allocation10 + $0x8] sm:$0xff]  }
  0x65   :  { %1193 = vmatpush3.bf16.msra.mxu1 %v1340_v27  ;;  %1172 = vmatprep.subr.bf16.mxu0 %v1341_v28  ;;  %v1387_v27 = vld [vmem:[#allocation10 + $0x10] sm:$0xff]   ;;  %v1388_v28 = vld [vmem:[#allocation10 + $0x18] sm:$0xff]  }
  0x66   :  { %1194 = vmatprep.subr.bf16.mxu1 %v1342_v29  ;;  %v1389_v29 = vld [vmem:[#allocation10 + $0x20] sm:$0xff]   ;;  %v1392_v12 = vld [vmem:[#allocation10 + $0x38] sm:$0xff]  }
  0x68   :  { %1173 = vmatpush3.bf16.msra.mxu0 %v1343_v30  ;;  %v1390_v30 = vld [vmem:[#allocation10 + $0x28] sm:$0xff]  }
  0x69   :  { %1195 = vmatpush3.bf16.msra.mxu1 %v1344_v31  ;;  %1202 = vmatprep.subr.bf16.mxu0 %v1345_v40  ;;  %v781_v31 = vlaneseq }
  0x6a   :  { %1224 = vmatprep.subr.bf16.mxu1 %v1346_v41  ;;  %v1069_v41 = vld [vmem:[%s1671_s3] ss:$0 sm:$0xff] }
  0x6b   :  { %651 = vmatmul.mubr.bf16.vlgmr.msra.gmra.mrb[0].mxu0 %v91_v37  ;;  %v782_v32 = vshrl.u32 %v781_v31, 7  ;;  %v786_v33 = vand.u32 127, %v781_v31  ;;  %v1146_v31 = vld [vmem:[%s1675_s7] ss:$0 sm:$0xff] }
  0x6c   :  { %691 = vmatmul.mubr.bf16.vlgmr.msra.gmra.mrb[0].mxu1 %v93_v39  ;;  %1203 = vmatpush3.bf16.msra.mxu0 %v1347_v42 }
  0x6d   :  { %1225 = vmatpush3.bf16.msra.mxu1 %v1348_v43  ;;  %1204 = vmatprep.subr.bf16.mxu0 %v1349_v44  ;;  %v787_v34 = vmul.u32 16777619, %v782_v32 }
  0x6e   :  { %1226 = vmatprep.subr.bf16.mxu1 %v1350_v45  ;;  %730 = vmatprep.mubr.bf16.mxu0 %v96_v10 }
  0x6f   :  { %770 = vmatprep.mubr.bf16.mxu1 %v98_v11  ;;  %v788_v35 = vadd.s32 %v787_v34, %v786_v33  ;;  %v1391_v11 = vld [vmem:[#allocation10 + $0x30] sm:$0xff]  }
  0x70   :  { %1205 = vmatpush3.bf16.msra.mxu0 %v1351_v46 }
  0x71   :  { %1227 = vmatpush3.bf16.msra.mxu1 %v1352_v47  ;;  %1206 = vmatprep.subr.bf16.mxu0 %v1353_v48  ;;  %v790_v37 = vadd.s32 %v789_v36, %v788_v35 }
  0x72   :  { %1228 = vmatprep.subr.bf16.mxu1 %v1354_v49 }
  0x73   :  { %v791_v38 = vadd.s32 1013904242, %v790_v37  ;;  %v916_v13 = vadd.s32 2654435769, %v790_v37 }
  0x74   :  { %1207 = vmatpush3.bf16.msra.mxu0 %v1355_v50 }
  0x75   :  { %1229 = vmatpush3.bf16.msra.mxu1 %v1356_v51  ;;  %1208 = vmatprep.subr.bf16.mxu0 %v1357_v52  ;;  %v792_v50 = vshrl.u32 %v791_v38, 16 }
  0x76   :  { %1230 = vmatprep.subr.bf16.mxu1 %v1358_v53 }
  0x77   :  { %v793_v53 = vxor.u32 %v792_v50, %v791_v38 }
  0x78   :  { %1209 = vmatpush3.bf16.msra.mxu0 %v1359_v54 }
  0x79   :  { %1231 = vmatpush3.bf16.msra.mxu1 %v1360_v55  ;;  %1210 = vmatprep.subr.bf16.mxu0 %v1361_v56  ;;  %v794_v54 = vmul.u32 2146121005, %v793_v53 }
  0x7a   :  { %1232 = vmatprep.subr.bf16.mxu1 %v1362_v57 }
  0x7b   :  { %v795_v55 = vshrl.u32 %v794_v54, 15 }
  0x7c   :  { %1211 = vmatpush3.bf16.msra.mxu0 %v1363_v58 }
  0x7d   :  { %1233 = vmatpush3.bf16.msra.mxu1 %v1364_v59  ;;  %1212 = vmatprep.subr.bf16.mxu0 %v1365_v60  ;;  %v796_v56 = vxor.u32 %v795_v55, %v794_v54 }
  0x7e   :  { %1234 = vmatprep.subr.bf16.mxu1 %v1366_v61 }
  0x7f   :  { %v797_v57 = vmul.u32 2221713035, %v796_v56 }
  0x80   :  { %1213 = vmatpush3.bf16.msra.mxu0 %v1367_v62 }
  0x81   :  { %1235 = vmatpush3.bf16.msra.mxu1 %v1368_v63  ;;  %1214 = vmatprep.subr.bf16.mxu0 %v1369_v0  ;;  %v798_v58 = vshrl.u32 %v797_v57, 16 }
  0x82   :  { %1236 = vmatprep.subr.bf16.mxu1 %v1370_v1 }
  0x83   :  { %v799_v59 = vxor.u32 %v798_v58, %v797_v57 }
  0x84   :  { %1215 = vmatpush3.bf16.msra.mxu0 %v1371_v2 }
  0x85   :  { %1237 = vmatpush3.bf16.msra.mxu1 %v1372_v3  ;;  %1216 = vmatprep.subr.bf16.mxu0 %v1373_v4  ;;  %v800_v2 = vshrl.u32 %v799_v59, 31 }
  0x86   :  { %1238 = vmatprep.subr.bf16.mxu1 %v1374_v5 }
  0x87   :  { %vm801_vm1 = vcmp.eq.s32.totalorder %v800_v2, 0 }
  0x88   :  { %1217 = vmatpush3.bf16.msra.mxu0 %v1375_v6  ;;  %vm1143_vm2 = vmpackc.low %vm801_vm1, %vm801_vm1 }
  0x89   :  { %1239 = vmatpush3.bf16.msra.mxu1 %v1376_v7  ;;  %1264 = vmatprep.subr.bf16.mxu0 %v1521_v17 }
  0x8a   :  { %1284 = vmatprep.subr.bf16.mxu1 %v1521_v17 }
  0x8b   :  { %731 = vmatmul.mubr.bf16.vlgmr.msra.gmra.mrb[4].mxu0 %v95_v14  ;;  %v917_v14 = vshrl.u32 %v916_v13, 16 }
  0x8c   :  { %771 = vmatmul.mubr.bf16.vlgmr.msra.gmra.mrb[4].mxu1 %v97_v15  ;;  %1265 = vmatpush3.bf16.msra.mxu0 %v1377_v16 }
  0x8d   :  { %1266 = vmatprep.subr.bf16.mxu0 %v1521_v17  ;;  %1280 = vmatprep.mubr.msk.bf16.mxu0 %vm1522_vm0, %v1521_v17  ;;  %v918_v15 = vxor.u32 %v917_v14, %v916_v13 }
  0x8e   :  { %1300 = vmatprep.mubr.msk.bf16.mxu1 %vm1522_vm0, %v1521_v17  ;;  %1285 = vmatpush3.bf16.msra.mxu1 %v1385_v25 }
  0x8f   :  { %1286 = vmatprep.subr.bf16.mxu1 %v1521_v17  ;;  %v919_v16 = vmul.u32 2146121005, %v918_v15 }
  0x90   :  { %1267 = vmatpush3.bf16.msra.mxu0 %v1378_v18 }
  0x91   :  { %1268 = vmatprep.subr.bf16.mxu0 %v1521_v17  ;;  %v920_v18 = vshrl.u32 %v919_v16, 15 }
  0x92   :  { %1287 = vmatpush3.bf16.msra.mxu1 %v1386_v26 }
  0x93   :  { %1288 = vmatprep.subr.bf16.mxu1 %v1521_v17 }
  0x94   :  { %1269 = vmatpush3.bf16.msra.mxu0 %v1379_v19  ;;  %v921_v19 = vxor.u32 %v920_v18, %v919_v16 }
  0x95   :  { %1270 = vmatprep.subr.bf16.mxu0 %v1521_v17 }
  0x96   :  { %1289 = vmatpush3.bf16.msra.mxu1 %v1387_v27 }
  0x97   :  { %1290 = vmatprep.subr.bf16.mxu1 %v1521_v17 }
  0x98   :  { %1271 = vmatpush3.bf16.msra.mxu0 %v1380_v20  ;;  %v922_v20 = vmul.u32 2221713035, %v921_v19 }
  0x99   :  { %1272 = vmatprep.subr.bf16.mxu0 %v1521_v17 }
  0x9a   :  { %1291 = vmatpush3.bf16.msra.mxu1 %v1388_v28 }
  0x9b   :  { %1292 = vmatprep.subr.bf16.mxu1 %v1521_v17 }
  0x9c   :  { %1273 = vmatpush3.bf16.msra.mxu0 %v1381_v21  ;;  %v923_v21 = vshrl.u32 %v922_v20, 16 }
  0x9d   :  { %1274 = vmatprep.subr.bf16.mxu0 %v1521_v17 }
  0x9e   :  { %1293 = vmatpush3.bf16.msra.mxu1 %v1389_v29 }
  0x9f   :  { %1294 = vmatprep.subr.bf16.mxu1 %v1521_v17 }
  0xa0   :  { %1275 = vmatpush3.bf16.msra.mxu0 %v1382_v22  ;;  %v924_v22 = vxor.u32 %v923_v21, %v922_v20 }
  0xa1   :  { %1276 = vmatprep.subr.bf16.mxu0 %v1521_v17 }
  0xa2   :  { %1295 = vmatpush3.bf16.msra.mxu1 %v1390_v30 }
  0xa3   :  { %1296 = vmatprep.subr.bf16.mxu1 %v1521_v17 }
  0xa4   :  { %1277 = vmatpush3.bf16.msra.mxu0 %v1383_v23  ;;  %v925_v23 = vshrl.u32 %v924_v22, 31 }
  0xa5   :  { %1278 = vmatprep.subr.bf16.mxu0 %v1521_v17 }
  0xa6   :  { %1297 = vmatpush3.bf16.msra.mxu1 %v1391_v11  ;;  %vm926_vm3 = vcmp.eq.s32.totalorder %v925_v23, 0 }
  0xa7   :  { %1298 = vmatprep.subr.bf16.mxu1 %v1521_v17  ;;  %vm1155_vm4 = vmpackc.low %vm926_vm3, %vm926_vm3 }
  0xa8   :  { %1279 = vmatpush3.bf16.msra.mxu0 %v1384_v24  ;;  %v1134_v24 = vld [vmem:[%s1673_s5] ss:$0 sm:$0xff]  ;;  %s1523_s5 = smov [#allocation12]  }
  0xa9   :  { %s1058_s12 = sshll.u32 %s1523_s5, 4  ;;  %s1059_s12 = int_to_ptr.vmem [resolvable:$true] %s1058_s12 }
  0xaa   :  { %1299 = vmatpush3.bf16.msra.mxu1 %v1392_v12  ;;  %s1485_s7 = scalar_lea.vmem %s1059_s12, 128  ;;  %p1490_p5 = scmp.lt.s32.totalorder %s1059_s12, %s1059_s12 }
  0xab   :  { %p1486_p4 = scmp.ne.s32.totalorder %s1059_s12, %s1485_s7  ;;  %p1491_p6 = scmp.lt.s32.totalorder %s1485_s7, %s1485_s7 }
  0xad   :  { %p1492_p7 = por %p1491_p6, %p1490_p5 }
  0xaf   :  { %p1493_p8 = pnand %p1492_p7, %p1486_p4 }
 0x13e   :  { %v1174_v39 = vpop.f32.mrb[0].mxu0 }
 0x13f   :  { %v1196_v40 = vpop.f32.mrb[0].mxu1  ;;  %v1175_v42 = vpop.f32.mrb[1].mxu0 }
 0x140   :  { %v1197_v43 = vpop.f32.mrb[1].mxu1  ;;  %v1176_v44 = vadd.f32 %v1175_v42, %v1174_v39  ;;  %v1177_v46 = vpop.f32.mrb[2].mxu0 }
 0x141   :  { %v1198_v45 = vadd.f32 %v1197_v43, %v1196_v40  ;;  %v1199_v47 = vpop.f32.mrb[2].mxu1  ;;  %v1178_v48 = vpop.f32.mrb[3].mxu0 }
 0x142   :  { %v1200_v49 = vpop.f32.mrb[3].mxu1  ;;  %v653_v51 = vadd.f32 %v1176_v44, %v1069_v41 }
 0x144   :  { %v693_v52 = vadd.f32 %v1198_v45, %v653_v51 }
 0x15e   :  { %v1218_v60 = vpop.f32.mrb[4].mxu0 }
 0x15f   :  { %v1240_v61 = vpop.f32.mrb[4].mxu1  ;;  %v1219_v62 = vpop.f32.mrb[5].mxu0 }
 0x160   :  { %v1220_v63 = vadd.f32 %v1219_v62, %v1218_v60  ;;  %v1241_v0 = vpop.f32.mrb[5].mxu1  ;;  %v1221_v1 = vpop.f32.mrb[6].mxu0 }
 0x161   :  { %v1242_v3 = vadd.f32 %v1241_v0, %v1240_v61  ;;  %v1243_v4 = vpop.f32.mrb[6].mxu1  ;;  %v1222_v5 = vpop.f32.mrb[7].mxu0 }
 0x162   :  { %v733_v6 = vadd.f32 %v1220_v63, %v693_v52  ;;  %v1244_v7 = vpop.f32.mrb[7].mxu1 }
 0x164   :  { %v773_v8 = vadd.f32 %v1242_v3, %v733_v6 }
 0x166   :  { %v778_v9 = vmax.f32 %v773_v8, 0.0 }
 0x168   :  { %v1144_v10 = vpack.c.bf16 %v778_v9, %v778_v9 }
 0x16a   :  { %1281 = vmatmul.mubr.msk.bf16.vlgmr.msra.gmra.mrb[8].mxu0 %vm1143_vm2, %v1144_v10 }
 0x23d   :  { %v909_v25 = vpop.f32.mrb[8].mxu0 }
 0x23e   :  { %v910_v26 = vadd.f32 %v1134_v24, %v909_v25  ;;  %v1282_v27 = vpop.f32.mrb[9].mxu0 }
 0x23f   :  { %v912_v17 = vpop.f32.mrb[10].mxu0 }
 0x240   :  { %v915_v28 = vmax.f32 %v910_v26, 0.0  ;;  %v1283_v29 = vpop.f32.mrb[11].mxu0 }
 0x242   :  { %v1156_v30 = vpack.c.bf16 %v915_v28, %v915_v28 }
 0x244   :  { %1301 = vmatmul.mubr.msk.bf16.vlgmr.msra.gmra.mrb[8].mxu1 %vm1155_vm4, %v1156_v30 }
 0x317   :  { %v1034_v32 = vpop.f32.mrb[8].mxu1 }
 0x318   :  { %v1035_v33 = vadd.f32 %v1146_v31, %v1034_v32  ;;  %v1302_v34 = vpop.f32.mrb[9].mxu1 }
 0x319   :  { %v1037_v35 = vpop.f32.mrb[10].mxu1 }
 0x31a   :  { %1040 = vmax.xlane.f32.xlu0 %v1035_v33  ;;  %v1303_v36 = vpop.f32.mrb[11].mxu1 }
 0x3a7   :  { %v1041_v37 = vpop.xlane.xlu0 %1040 }
 0x3a8   :  { %v1042_v38 = vsub.f32 %v1035_v33, %v1041_v37 }
 0x3aa   :  { %v1043_v39 = vmul.f32 1.442695, %v1042_v38 }
 0x3ac   :  { %1393 = vpow2.f32 %v1043_v39 }
 0x3b6   :  { %v1394_v40 = vpop.eup %1393 }
 0x3b7   :  { %1045 = vadd.xlane.f32.xlu0 %v1394_v40 }
 0x444   :  { %v1046_v41 = vpop.xlane.xlu0 %1045 }
 0x445   :  { %1395 = vlog2.f32 %v1046_v41 }
 0x44f   :  { %v1396_v42 = vpop.eup %1395 }
 0x450   :  { %v1048_v43 = vmul.f32 0.6931472, %v1396_v42 }
 0x452   :  { %v1049_v44 = vsub.f32 %v1042_v38, %v1048_v43 }
 0x454   :  { %1051 = vst.msk [vmem:[#allocation12] sm:$0xff] %vm1050_vm5, %v1049_v44 }
 0x455   :  { %1496 = shalt.err (!%p1493_p8)
}
 0x456   :  { %s1497_s17 = scalar_lea.hbm %s1676_s8, 128 }
 0x457   :  { %p1498_p9 = scmp.ne.s32.totalorder %s1676_s8, %s1497_s17  ;;  %p1501_p10 = scmp.lt.u32.totalorder %s1497_s17, %s1676_s8 }
 0x459   :  { %p1503_p11 = pnand %p1501_p10, %p1498_p9 }
 0x45b   :  { %1506 = shalt.err (!%p1503_p11)
}
 0x45c   :  { %1061 = dma.vmem_to_hbm [thread:$0]  %s1059_s12, 128, %s1676_s8, [#allocation6]  }
 0x45d   :  { %1513 = dma.done.wait [#allocation6], 128  }
 0x45e   :  { %1514 = vsyncadd [#allocation6], 4294967168 }
 0x45f   :  { %1065 = vsyncpa [#allocation5], 1 }
 0x460   :  { %1066 = vsyncpa [#allocation8], 1 }
 0x461   :  { %1067 = vsyncpa [#allocation11], 1 }
 0x462   :  { %1068 = vsyncpa [#allocation6], 1 }

</bundles_post_ra>
